<compile_context>
chip_gen: v7x
topology: tpu7x:2x2x1
jax: 0.10.0
libtpu: 0.0.40
codegen_flags: <defaults>
</compile_context>

<pallas_src>
import math

import jax
import jax.numpy as jnp
from jax.experimental import pallas as pl
from jax.experimental.pallas import tpu as pltpu


# ---------------------------------------------------------------------------
# VMEM budgeting (generation-aware).
# ---------------------------------------------------------------------------
def _vmem_capacity_bytes():
    try:
        return int(pltpu.get_tpu_info().vmem_capacity_bytes)
    except Exception:
        return 64 * 1024 * 1024  # conservative fallback (v7x per-TC VMEM)


def _vmem_budget():
    cap = _vmem_capacity_bytes()
    budget = int(cap * 0.70)      # what the tile picker may spend on blocks
    limit = int(cap * 0.80)       # what we tell Mosaic (headroom for scratch)
    return budget, limit


# ---------------------------------------------------------------------------
# Kernel.
# ---------------------------------------------------------------------------
def _make_gru_kernel(tile_n, hidden_axis):
    """Build the per-tile GRU kernel.

    Kernel refs:
      x_ref  : (TB, IN)      input activations (full K, compute dtype)
      hk_ref : (TB, H)       hidden state (full K, compute dtype)
      wx_ref : (IN, 3*TN)    x2h weights, per-tile gate-interleaved [R_j|I_j|N_j]
      wh_ref : (H, 3*TN)     h2h weights, same layout
      bx_ref : (1, 3*TN)     combined bias [bx_r+bh_r | bx_i+bh_i | bx_n] (f32)
      bhn_ref: (1, TN)       bh_n slice (f32) -- added inside the reset gate
      out_ref: (TB, TN)
    """
    tn = tile_n

    def kernel(x_ref, hk_ref, wx_ref, wh_ref, bx_ref, bhn_ref, out_ref):
        # Two wide-N MXU matmuls covering all three gates; f32 accumulation.
        gate_x = jnp.dot(x_ref[...], wx_ref[...],
                         preferred_element_type=jnp.float32) + bx_ref[...]
        gate_h = jnp.dot(hk_ref[...], wh_ref[...],
                         preferred_element_type=jnp.float32)

        i_r = gate_x[:, 0 * tn:1 * tn]
        i_i = gate_x[:, 1 * tn:2 * tn]
        i_n = gate_x[:, 2 * tn:3 * tn]
        h_r = gate_h[:, 0 * tn:1 * tn]
        h_i = gate_h[:, 1 * tn:2 * tn]
        h_n = gate_h[:, 2 * tn:3 * tn] + bhn_ref[...]

        # Elementwise GRU update in f32 (EUP sigmoid/tanh; VPU blend).
        resetgate = jax.nn.sigmoid(i_r + h_r)
        inputgate = jax.nn.sigmoid(i_i + h_i)
        newgate = jnp.tanh(i_n + resetgate * h_n)

        # Hidden slice for the blend comes from the already-resident full-K
        # hidden block (no separate DMA stream).
        if hk_ref.shape[1] == tn:
            h = hk_ref[...]
        else:
            j = pl.program_id(hidden_axis)
            off = pl.multiple_of(j * tn, tn)
            h = hk_ref[:, pl.ds(off, tn)]
        h = h.astype(jnp.float32)

        hy = newgate + inputgate * (h - newgate)
        out_ref[...] = hy.astype(out_ref.dtype)

    return kernel


# ---------------------------------------------------------------------------
# Tile selection.
# ---------------------------------------------------------------------------
def _pick_tiles(B, IN, H, itemsize, budget):
    """Pick (tile_b, tile_n) under a VMEM budget; prefer full-H residency."""
    if itemsize < 4:
        tb_cands = (512, 256, 128, 64, 32, 16)     # sub-32-bit: sublane packing
    else:
        tb_cands = (512, 256, 128, 64, 32, 16, 8)
    tile_b = next((c for c in tb_cands if B % c == 0), B)

    def fits(tb, tn):
        w = 2 * (IN + H) * 3 * tn * itemsize            # double-buffered weights
        a = 2 * tb * (IN + H) * itemsize                # x + hk blocks
        o = 2 * tb * tn * 4                             # output block (f32)
        bias = 2 * 4 * tn * 4                           # bx (3*tn) + bhn (tn)
        tmp = tb * 3 * tn * 4 * 2                       # gate_x + gate_h f32 temps
        return w + a + o + bias + tmp <= budget

    # Fast path: full hidden width -> weights DMA'd exactly once.
    if fits(tile_b, H):
        return tile_b, H

    tn_cands = [c for c in (1024, 512, 256, 128) if H % c == 0]
    if not tn_cands:
        return tile_b, H                                # small H: full lane block
    for tn in tn_cands:
        if fits(tile_b, tn):
            return tile_b, tn
    for tb in tb_cands:
        if B % tb != 0 or tb >= tile_b:
            continue
        for tn in tn_cands:
            if fits(tb, tn):
                return tb, tn
    return tile_b, tn_cands[-1]


# ---------------------------------------------------------------------------
# One-time parameter preparation (hoist out of any per-timestep loop).
# ---------------------------------------------------------------------------
def prepare_gru_params(w_x2h, b_x2h, w_h2h, b_h2h, hidden_size, tile_n,
                       compute_dtype=jnp.bfloat16):
    """Transpose + per-tile gate interleave + dtype cast + bias folding.

    PyTorch layout in: w_* is (3H, K), b_* is (3H,), rows/cols [R | I | N].
    Out weights: (K, 3H) where column block j (width 3*tile_n) = [R_j|I_j|N_j].
    Biases: bh_r, bh_i are folded into the x-side bias; bh_n stays separate
    (it must remain inside the reset-gated term).
    """
    H = hidden_size
    assert H % tile_n == 0
    nj = H // tile_n

    def reorder_w(w):
        K = w.shape[1]
        wt = w.T.reshape(K, 3, nj, tile_n)            # (K, gate, tile, within)
        wt = jnp.transpose(wt, (0, 2, 1, 3))          # (K, tile, gate, within)
        return wt.reshape(K, 3 * H).astype(compute_dtype)

    def reorder_b(b):
        bt = b.reshape(3, nj, tile_n)
        bt = jnp.transpose(bt, (1, 0, 2))
        return bt.reshape(1, 3 * H)

    bhr, bhi, bhn = b_h2h[:H], b_h2h[H:2 * H], b_h2h[2 * H:]
    bx_comb = jnp.concatenate(
        [b_x2h[:H] + bhr, b_x2h[H:2 * H] + bhi, b_x2h[2 * H:]])
    bx_comb = reorder_b(bx_comb).astype(jnp.float32)
    bhn = bhn.reshape(1, H).astype(jnp.float32)

    return reorder_w(w_x2h), reorder_w(w_h2h), bx_comb, bhn


# ---------------------------------------------------------------------------
# pallas_call wrapper.
# ---------------------------------------------------------------------------
def gru_cell_apply(x, hidden, params, *, tile_b, tile_n, vmem_limit_bytes):
    """Run the Pallas GRU cell with pre-prepared params."""
    wx, wh, bx, bhn = params
    B, IN = x.shape
    _, H = hidden.shape
    assert B % tile_b == 0 and H % tile_n == 0
    nB = B // tile_b
    nJ = H // tile_n

    cdt = wx.dtype
    x_mm = x.astype(cdt)
    h_mm = hidden.astype(cdt)
    out_shape = jax.ShapeDtypeStruct((B, H), hidden.dtype)

    if nJ == 1:
        # Fast path: weights fully VMEM-resident; 1-D grid over batch tiles.
        grid = (nB,)
        in_specs = [
            pl.BlockSpec((tile_b, IN), lambda i: (i, 0)),       # x
            pl.BlockSpec((tile_b, H), lambda i: (i, 0)),        # h (full K)
            pl.BlockSpec((IN, 3 * H), lambda i: (0, 0)),        # Wx (resident)
            pl.BlockSpec((H, 3 * H), lambda i: (0, 0)),         # Wh (resident)
            pl.BlockSpec((1, 3 * H), lambda i: (0, 0)),         # bx
            pl.BlockSpec((1, H), lambda i: (0, 0)),             # bh_n
        ]
        out_specs = pl.BlockSpec((tile_b, H), lambda i: (i, 0))
        dim_sem = ("parallel",)
        hidden_axis = 0        # unused: kernel takes the full-H branch
    else:
        # Choose which operand sits on the constant-index (inner) axis by
        # comparing re-read HBM bytes (itemsize cancels).
        weight_reread = (nB - 1) * 3 * H * (IN + H)
        act_reread = (nJ - 1) * B * (IN + H)
        if weight_reread >= act_reread:
            # Weight-resident ordering: hidden axis OUTER, batch axis inner.
            # Weight blocks keep a constant block index along the inner axis
            # (no re-DMA per batch tile); leading parallel axis = weight
            # columns, so v7x TCs get disjoint weight halves.
            grid = (nJ, nB)
            hidden_axis = 0
            in_specs = [
                pl.BlockSpec((tile_b, IN), lambda j, i: (i, 0)),
                pl.BlockSpec((tile_b, H), lambda j, i: (i, 0)),
                pl.BlockSpec((IN, 3 * tile_n), lambda j, i: (0, j)),
                pl.BlockSpec((H, 3 * tile_n), lambda j, i: (0, j)),
                pl.BlockSpec((1, 3 * tile_n), lambda j, i: (0, j)),
                pl.BlockSpec((1, tile_n), lambda j, i: (0, j)),
            ]
            out_specs = pl.BlockSpec((tile_b, tile_n), lambda j, i: (i, j))
        else:
            # Activation-resident ordering: batch axis outer, hidden inner.
            grid = (nB, nJ)
            hidden_axis = 1
            in_specs = [
                pl.BlockSpec((tile_b, IN), lambda i, j: (i, 0)),
                pl.BlockSpec((tile_b, H), lambda i, j: (i, 0)),
                pl.BlockSpec((IN, 3 * tile_n), lambda i, j: (0, j)),
                pl.BlockSpec((H, 3 * tile_n), lambda i, j: (0, j)),
                pl.BlockSpec((1, 3 * tile_n), lambda i, j: (0, j)),
                pl.BlockSpec((1, tile_n), lambda i, j: (0, j)),
            ]
            out_specs = pl.BlockSpec((tile_b, tile_n), lambda i, j: (i, j))
        dim_sem = ("parallel", "parallel")

    kernel = _make_gru_kernel(tile_n, hidden_axis)
    return pl.pallas_call(
        kernel,
        out_shape=out_shape,
        grid_spec=pltpu.PrefetchScalarGridSpec(
            num_scalar_prefetch=0,
            grid=grid,
            in_specs=in_specs,
            out_specs=out_specs,
        ),
        compiler_params=pltpu.CompilerParams(
            dimension_semantics=dim_sem,
            vmem_limit_bytes=vmem_limit_bytes,
        ),
    )(x_mm, h_mm, wx, wh, bx, bhn)


def gru_cell(x, hidden, w_x2h, b_x2h, w_h2h, b_h2h, *,
             compute_dtype=None, tile_b=None, tile_n=None):
    """Pallas GRUCell forward (single timestep).

    x:       (B, input_size)
    hidden:  (B, hidden_size)
    w_x2h:   (3*hidden_size, input_size)   (PyTorch nn.Linear layout)
    b_x2h:   (3*hidden_size,)
    w_h2h:   (3*hidden_size, hidden_size)
    b_h2h:   (3*hidden_size,)
    returns: (B, hidden_size)

    compute_dtype defaults to bfloat16 (MXU inputs); accumulation and all
    nonlinear/blend math stay in float32.
    """
    x = x.reshape(-1, x.shape[1])            # mirrors x.view(-1, x.size(1))
    B, IN = x.shape
    _, H = hidden.shape

    compute_dtype = compute_dtype if compute_dtype is not None else jnp.bfloat16
    itemsize = jnp.dtype(compute_dtype).itemsize

    budget, vmem_limit = _vmem_budget()
    auto_tb, auto_tn = _pick_tiles(B, IN, H, itemsize, budget)
    tile_b = tile_b or auto_tb
    tile_n = tile_n or auto_tn

    params = prepare_gru_params(w_x2h, b_x2h, w_h2h, b_h2h, H, tile_n,
                                compute_dtype=compute_dtype)
    return gru_cell_apply(x, hidden, params, tile_b=tile_b, tile_n=tile_n,
                          vmem_limit_bytes=vmem_limit)


# ---------------------------------------------------------------------------
# Pure-JAX reference mirroring the PyTorch forward.
# ---------------------------------------------------------------------------
def gru_cell_ref(x, hidden, w_x2h, b_x2h, w_h2h, b_h2h):
    H = hidden.shape[1]
    gate_x = x @ w_x2h.T + b_x2h
    gate_h = hidden @ w_h2h.T + b_h2h
    i_r, i_i, i_n = gate_x[:, :H], gate_x[:, H:2 * H], gate_x[:, 2 * H:]
    h_r, h_i, h_n = gate_h[:, :H], gate_h[:, H:2 * H], gate_h[:, 2 * H:]
    resetgate = jax.nn.sigmoid(i_r + h_r)
    inputgate = jax.nn.sigmoid(i_i + h_i)
    newgate = jnp.tanh(i_n + resetgate * h_n)
    return newgate + inputgate * (hidden - newgate)


def _make_inputs(key, B, input_size, hidden_size):
    std = 1.0 / math.sqrt(hidden_size)
    kx, kh, k1, k2, k3, k4 = jax.random.split(key, 6)
    x = jax.random.normal(kx, (B, input_size), dtype=jnp.float32)
    hidden = jax.random.normal(kh, (B, hidden_size), dtype=jnp.float32)
    w_x2h = jax.random.uniform(k1, (3 * hidden_size, input_size),
                               minval=-std, maxval=std, dtype=jnp.float32)
    b_x2h = jax.random.uniform(k2, (3 * hidden_size,),
                               minval=-std, maxval=std, dtype=jnp.float32)
    w_h2h = jax.random.uniform(k3, (3 * hidden_size, hidden_size),
                               minval=-std, maxval=std, dtype=jnp.float32)
    b_h2h = jax.random.uniform(k4, (3 * hidden_size,),
                               minval=-std, maxval=std, dtype=jnp.float32)
    return x, hidden, w_x2h, b_x2h, w_h2h, b_h2h


if __name__ == "__main__":
    key = jax.random.PRNGKey(0)
    k_small, k_big = jax.random.split(key, 2)

    # --- Small shapes matching the original module demo (single tile,
    #     weights fully resident, f32 for bit-tight comparison). ---
    B, input_size, hidden_size = 8, 16, 32
    args = _make_inputs(k_small, B, input_size, hidden_size)
    hy = jax.block_until_ready(gru_cell(*args, compute_dtype=jnp.float32))
    hy_ref = gru_cell_ref(*args)
    assert hy.shape == (B, hidden_size)
    assert jnp.allclose(hy, hy_ref, atol=1e-5, rtol=1e-5)

    # --- MXU-shaped case: default bf16 weights/activations, auto tiles
    #     (weights fully VMEM-resident -> 1-D grid over batch). ---
    B2, in2, H2 = 256, 128, 256
    args2 = _make_inputs(k_big, B2, in2, H2)
    hy2_ref = gru_cell_ref(*args2)
    hy2 = jax.block_until_ready(gru_cell(*args2))
    assert jnp.allclose(hy2, hy2_ref, atol=5e-2, rtol=5e-2)

    # --- Force the 2-D tiled grid, weight-resident ordering
    #     (hidden axis outer, batch inner), f32. ---
    hy3 = jax.block_until_ready(
        gru_cell(*args2, compute_dtype=jnp.float32, tile_b=128, tile_n=128))
    assert jnp.allclose(hy3, hy2_ref, atol=1e-4, rtol=1e-4)

    # --- Force the 2-D tiled grid, activation-resident ordering
    #     (batch axis outer, hidden inner), f32. ---
    hy4 = jax.block_until_ready(
        gru_cell(*args2, compute_dtype=jnp.float32, tile_b=256, tile_n=128))
    assert jnp.allclose(hy4, hy2_ref, atol=1e-4, rtol=1e-4)

    print("KERNEL_OK")
</pallas_src>

<mosaic_0001>
module attributes {stable_mosaic.version = 11 : i64} {
  func.func @kernel(%arg0: i32, %arg1: memref<8x16xf32, #tpu.memory_space<vmem>>, %arg2: memref<8x32xf32, #tpu.memory_space<vmem>>, %arg3: memref<16x96xf32, #tpu.memory_space<vmem>>, %arg4: memref<32x96xf32, #tpu.memory_space<vmem>>, %arg5: memref<1x96xf32, #tpu.memory_space<vmem>>, %arg6: memref<1x32xf32, #tpu.memory_space<vmem>>, %arg7: memref<8x32xf32, #tpu.memory_space<vmem>>) attributes {dimension_semantics = [#tpu.dimension_semantics<parallel>], iteration_bounds = array<i64: 1>, scalar_prefetch = 0 : i64, scratch_operands = 0 : i64, tpu.core_type = #tpu.core_type<tc>, window_params = [{transform_indices = @transform_0, window_bounds = array<i64: 8, 16>}, {transform_indices = @transform_1, window_bounds = array<i64: 8, 32>}, {pipeline_mode = #tpu.pipeline_mode<synchronous>, transform_indices = @transform_2, window_bounds = array<i64: 16, 96>}, {pipeline_mode = #tpu.pipeline_mode<synchronous>, transform_indices = @transform_3, window_bounds = array<i64: 32, 96>}, {pipeline_mode = #tpu.pipeline_mode<synchronous>, transform_indices = @transform_4, window_bounds = array<i64: 1, 96>}, {pipeline_mode = #tpu.pipeline_mode<synchronous>, transform_indices = @transform_5, window_bounds = array<i64: 1, 32>}, {transform_indices = @transform_6, window_bounds = array<i64: 8, 32>}]} {
    %c0 = arith.constant 0 : index
    %c0_0 = arith.constant 0 : index
    %0 = vector.load %arg1[%c0, %c0_0] : memref<8x16xf32, #tpu.memory_space<vmem>>, vector<8x16xf32>
    %c0_1 = arith.constant 0 : index
    %c0_2 = arith.constant 0 : index
    %1 = vector.load %arg3[%c0_1, %c0_2] : memref<16x96xf32, #tpu.memory_space<vmem>>, vector<16x96xf32>
    %cst = arith.constant dense<0.000000e+00> : vector<8x96xf32>
    %2 = tpu.matmul %0, %1, %cst {dimension_numbers = #tpu.dot_dimension_numbers<[1], [0], [0], [1], [0, 0, 1, 1], [], []>} : vector<8x16xf32>, vector<16x96xf32>, vector<8x96xf32> -> vector<8x96xf32>
    %c0_3 = arith.constant 0 : index
    %c0_4 = arith.constant 0 : index
    %3 = vector.load %arg5[%c0_3, %c0_4] : memref<1x96xf32, #tpu.memory_space<vmem>>, vector<1x96xf32>
    %4 = vector.broadcast %3 : vector<1x96xf32> to vector<8x96xf32>
    %5 = arith.addf %2, %4 : vector<8x96xf32>
    %c0_5 = arith.constant 0 : index
    %c0_6 = arith.constant 0 : index
    %6 = vector.load %arg2[%c0_5, %c0_6] : memref<8x32xf32, #tpu.memory_space<vmem>>, vector<8x32xf32>
    %c0_7 = arith.constant 0 : index
    %c0_8 = arith.constant 0 : index
    %7 = vector.load %arg4[%c0_7, %c0_8] : memref<32x96xf32, #tpu.memory_space<vmem>>, vector<32x96xf32>
    %cst_9 = arith.constant dense<0.000000e+00> : vector<8x96xf32>
    %8 = tpu.matmul %6, %7, %cst_9 {dimension_numbers = #tpu.dot_dimension_numbers<[1], [0], [0], [1], [0, 0, 1, 1], [], []>} : vector<8x32xf32>, vector<32x96xf32>, vector<8x96xf32> -> vector<8x96xf32>
    %9 = vector.extract_strided_slice %5 {offsets = [0, 0], sizes = [8, 32], strides = [1, 1]} : vector<8x96xf32> to vector<8x32xf32>
    %10 = vector.extract_strided_slice %5 {offsets = [0, 32], sizes = [8, 32], strides = [1, 1]} : vector<8x96xf32> to vector<8x32xf32>
    %11 = vector.extract_strided_slice %5 {offsets = [0, 64], sizes = [8, 32], strides = [1, 1]} : vector<8x96xf32> to vector<8x32xf32>
    %12 = vector.extract_strided_slice %8 {offsets = [0, 0], sizes = [8, 32], strides = [1, 1]} : vector<8x96xf32> to vector<8x32xf32>
    %13 = vector.extract_strided_slice %8 {offsets = [0, 32], sizes = [8, 32], strides = [1, 1]} : vector<8x96xf32> to vector<8x32xf32>
    %14 = vector.extract_strided_slice %8 {offsets = [0, 64], sizes = [8, 32], strides = [1, 1]} : vector<8x96xf32> to vector<8x32xf32>
    %c0_10 = arith.constant 0 : index
    %c0_11 = arith.constant 0 : index
    %15 = vector.load %arg6[%c0_10, %c0_11] : memref<1x32xf32, #tpu.memory_space<vmem>>, vector<1x32xf32>
    %16 = vector.broadcast %15 : vector<1x32xf32> to vector<8x32xf32>
    %17 = arith.addf %14, %16 : vector<8x32xf32>
    %18 = arith.addf %9, %12 : vector<8x32xf32>
    %19 = arith.negf %18 : vector<8x32xf32>
    %20 = math.exp %19 : vector<8x32xf32>
    %cst_12 = arith.constant 1.000000e+00 : f32
    %21 = vector.broadcast %cst_12 : f32 to vector<8x32xf32>
    %22 = arith.addf %21, %20 : vector<8x32xf32>
    %23 = arith.divf %21, %22 : vector<8x32xf32>
    %24 = arith.addf %10, %13 : vector<8x32xf32>
    %25 = arith.negf %24 : vector<8x32xf32>
    %26 = math.exp %25 : vector<8x32xf32>
    %cst_13 = arith.constant 1.000000e+00 : f32
    %27 = vector.broadcast %cst_13 : f32 to vector<8x32xf32>
    %28 = arith.addf %27, %26 : vector<8x32xf32>
    %29 = arith.divf %27, %28 : vector<8x32xf32>
    %30 = arith.mulf %23, %17 : vector<8x32xf32>
    %31 = arith.addf %11, %30 : vector<8x32xf32>
    %32 = math.tanh %31 : vector<8x32xf32>
    %c0_14 = arith.constant 0 : index
    %c0_15 = arith.constant 0 : index
    %33 = vector.load %arg2[%c0_14, %c0_15] : memref<8x32xf32, #tpu.memory_space<vmem>>, vector<8x32xf32>
    %34 = arith.subf %33, %32 : vector<8x32xf32>
    %35 = arith.mulf %29, %34 : vector<8x32xf32>
    %36 = arith.addf %32, %35 : vector<8x32xf32>
    %c0_16 = arith.constant 0 : index
    %c0_17 = arith.constant 0 : index
    %37 = vector.load %arg7[%c0_16, %c0_17] : memref<8x32xf32, #tpu.memory_space<vmem>>, vector<8x32xf32>
    tpu.vector_store %arg7[%c0_16, %c0_17], %36 {strides = array<i32>} : memref<8x32xf32, #tpu.memory_space<vmem>>, vector<8x32xf32>,
    return
  }
  func.func @transform_0(%arg0: i32) -> (i32, i32) {
    %c0_i32 = arith.constant 0 : i32
    %c0_i32_0 = arith.constant 0 : i32
    return %arg0, %c0_i32 : i32, i32
  }
  func.func @transform_1(%arg0: i32) -> (i32, i32) {
    %c0_i32 = arith.constant 0 : i32
    %c0_i32_0 = arith.constant 0 : i32
    return %arg0, %c0_i32 : i32, i32
  }
  func.func @transform_2(%arg0: i32) -> (i32, i32) {
    %c0_i32 = arith.constant 0 : i32
    %c0_i32_0 = arith.constant 0 : i32
    %c0_i32_1 = arith.constant 0 : i32
    return %c0_i32, %c0_i32_0 : i32, i32
  }
  func.func @transform_3(%arg0: i32) -> (i32, i32) {
    %c0_i32 = arith.constant 0 : i32
    %c0_i32_0 = arith.constant 0 : i32
    %c0_i32_1 = arith.constant 0 : i32
    return %c0_i32, %c0_i32_0 : i32, i32
  }
  func.func @transform_4(%arg0: i32) -> (i32, i32) {
    %c0_i32 = arith.constant 0 : i32
    %c0_i32_0 = arith.constant 0 : i32
    %c0_i32_1 = arith.constant 0 : i32
    return %c0_i32, %c0_i32_0 : i32, i32
  }
  func.func @transform_5(%arg0: i32) -> (i32, i32) {
    %c0_i32 = arith.constant 0 : i32
    %c0_i32_0 = arith.constant 0 : i32
    %c0_i32_1 = arith.constant 0 : i32
    return %c0_i32, %c0_i32_0 : i32, i32
  }
  func.func @transform_6(%arg0: i32) -> (i32, i32) {
    %c0_i32 = arith.constant 0 : i32
    %c0_i32_0 = arith.constant 0 : i32
    return %arg0, %c0_i32 : i32, i32
  }
}

</mosaic_0001>

<bundles_post_ra>
// kernel: tpu_custom_call.1
= control target key start
LH: loop header
LB: loop body
LE: loop exit
PB: predicated region body
PF: predicated region fallthrough
CT: control target
= control target key end

     0   :  { %11 = vsyncpa [#allocation3], 0  ;;  %s599_s0 = inlined_call_operand.hbm [shape: f32[8,16], index: 0, kind: input, shape index: {}]   ;;  %s600_s1 = inlined_call_operand.hbm [shape: f32[8,32], index: 1, kind: input, shape index: {}]   ;;  %s601_s2 = inlined_call_operand.hbm [shape: f32[16,96], index: 2, kind: input, shape index: {}]   ;;  %s602_s3 = inlined_call_operand.hbm [shape: f32[32,96], index: 3, kind: input, shape index: {}]   ;;  %s603_s4 = inlined_call_operand.vmem [shape: f32[1,96], index: 4, kind: input, shape index: {}]   ;;  %s604_s5 = inlined_call_operand.vmem [shape: f32[1,32], index: 5, kind: input, shape index: {}]   ;;  %s605_s6 = inlined_call_operand.hbm [shape: f32[8,32], index: 6, kind: output, shape index: {}]  }
   0x1   :  { %12 = vsyncpa [#allocation6], 0 }
   0x2   :  { %13 = vsyncpa [#allocation9], 0 }
   0x3   :  { %14 = vsyncpa [#allocation4], 0  ;;  %s479_s21 = smov [#allocation5]   ;;  %s480_s23 = smov [#allocation2]  }
   0x4   :  { %s31_s22 = sshll.u32 %s479_s21, 4  ;;  %s21_s24 = sshll.u32 %s480_s23, 4  ;;  %s32_s22 = int_to_ptr.vmem [resolvable:$true] %s31_s22  ;;  %s22_s24 = int_to_ptr.vmem [resolvable:$true] %s21_s24 }
   0x5   :  { %s361_s27 = scalar_lea.hbm %s600_s1, 128 }
   0x6   :  { %p362_p0 = scmp.ne.s32.totalorder %s600_s1, %s361_s27  ;;  %p365_p1 = scmp.lt.u32.totalorder %s361_s27, %s600_s1 }
   0x8   :  { %p367_p2 = pnand %p365_p1, %p362_p0 }
   0xa   :  { %370 = shalt.err (!%p367_p2)
}
   0xb   :  { %s371_s8 = scalar_lea.vmem %s32_s22, 128  ;;  %p376_p4 = scmp.lt.s32.totalorder %s32_s22, %s32_s22 }
   0xc   :  { %p372_p3 = scmp.ne.s32.totalorder %s32_s22, %s371_s8  ;;  %p377_p5 = scmp.lt.s32.totalorder %s371_s8, %s371_s8 }
   0xe   :  { %p378_p6 = por %p377_p5, %p376_p4 }
  0x10   :  { %p379_p7 = pnand %p378_p6, %p372_p3 }
  0x12   :  { %382 = shalt.err (!%p379_p7)
}
  0x13   :  { %34 = dma.hbm_to_vmem [thread:$0]  %s600_s1, 128, %s32_s22, [#allocation6]  }
  0x14   :  { %s383_s13 = scalar_lea.hbm %s599_s0, 128 }
  0x15   :  { %p384_p8 = scmp.ne.s32.totalorder %s599_s0, %s383_s13  ;;  %p387_p9 = scmp.lt.u32.totalorder %s383_s13, %s599_s0 }
  0x17   :  { %p389_p10 = pnand %p387_p9, %p384_p8 }
  0x19   :  { %392 = shalt.err (!%p389_p10)
}
  0x1a   :  { %s393_s18 = scalar_lea.vmem %s22_s24, 128  ;;  %p398_p12 = scmp.lt.s32.totalorder %s22_s24, %s22_s24 }
  0x1b   :  { %p394_p11 = scmp.ne.s32.totalorder %s22_s24, %s393_s18  ;;  %p399_p13 = scmp.lt.s32.totalorder %s393_s18, %s393_s18 }
  0x1d   :  { %p400_p0 = por %p399_p13, %p398_p12 }
  0x1f   :  { %p401_p1 = pnand %p400_p0, %p394_p11 }
  0x21   :  { %404 = shalt.err (!%p401_p1)
}
  0x22   :  { %24 = dma.hbm_to_vmem [thread:$0]  %s599_s0, 128, %s22_s24, [#allocation3]  }
  0x23   :  { %s481_s20 = smov [#allocation7]   ;;  %s405_s25 = scalar_lea.hbm %s601_s2, 256 }
  0x24   :  { %s40_s21 = sshll.u32 %s481_s20, 4  ;;  %p406_p2 = scmp.ne.s32.totalorder %s601_s2, %s405_s25  ;;  %s41_s21 = int_to_ptr.vmem [resolvable:$true] %s40_s21 }
  0x25   :  { %p409_p3 = scmp.lt.u32.totalorder %s405_s25, %s601_s2 }
  0x27   :  { %p411_p4 = pnand %p409_p3, %p406_p2 }
  0x29   :  { %414 = shalt.err (!%p411_p4)
}
  0x2a   :  { %s415_s30 = scalar_lea.vmem %s41_s21, 256  ;;  %p420_p6 = scmp.lt.s32.totalorder %s41_s21, %s41_s21 }
  0x2b   :  { %p416_p5 = scmp.ne.s32.totalorder %s41_s21, %s415_s30  ;;  %p421_p7 = scmp.lt.s32.totalorder %s415_s30, %s415_s30 }
  0x2d   :  { %p422_p8 = por %p421_p7, %p420_p6 }
  0x2f   :  { %p423_p9 = pnand %p422_p8, %p416_p5 }
  0x31   :  { %426 = shalt.err (!%p423_p9)
}
  0x32   :  { %s482_s0 = smov 128   ;;  %s483_s24 = smov 8  }
  0x33   :  { %46 = dma.hbm_to_vmem [thread:$0]  %s601_s2, 256, %s41_s21, [#allocation6], %s482_s0, %s482_s0, %s483_s24  }
  0x34   :  { %s484_s9 = smov [#allocation8]   ;;  %s427_s13 = scalar_lea.hbm %s602_s3, 512 }
  0x35   :  { %s52_s10 = sshll.u32 %s484_s9, 4  ;;  %p428_p10 = scmp.ne.s32.totalorder %s602_s3, %s427_s13  ;;  %s53_s10 = int_to_ptr.vmem [resolvable:$true] %s52_s10 }
  0x36   :  { %p431_p11 = scmp.lt.u32.totalorder %s427_s13, %s602_s3 }
  0x38   :  { %p433_p12 = pnand %p431_p11, %p428_p10 }
  0x3a   :  { %436 = shalt.err (!%p433_p12)
}
  0x3b   :  { %s437_s18 = scalar_lea.vmem %s53_s10, 512  ;;  %p442_p0 = scmp.lt.s32.totalorder %s53_s10, %s53_s10 }
  0x3c   :  { %p438_p13 = scmp.ne.s32.totalorder %s53_s10, %s437_s18  ;;  %p443_p1 = scmp.lt.s32.totalorder %s437_s18, %s437_s18 }
  0x3e   :  { %p444_p2 = por %p443_p1, %p442_p0 }
  0x40   :  { %p445_p3 = pnand %p444_p2, %p438_p13 }
  0x42   :  { %448 = shalt.err (!%p445_p3)
}
  0x43   :  { %58 = dma.hbm_to_vmem [thread:$0]  %s602_s3, 512, %s53_s10, [#allocation9], %s482_s0, %s482_s0, %s483_s24  }
  0x44   :  { %471 = dma.done.wait [#allocation3], 128  }
  0x45   :  { %472 = vsyncadd [#allocation3], 4294967168 }
  0x46   :  { %473 = dma.done.wait [#allocation6], 384  }
  0x47   :  { %474 = vsyncadd [#allocation6], 4294966912 }
  0x48   :  { %475 = dma.done.wait [#allocation9], 512  }
  0x49   :  { %476 = vsyncadd [#allocation9], 4294966784  ;;  %v485_v0 = vmov 0.0|0.0   ;;  %vm486_vm0 = vmmov 0   ;;  %v487_v1 = vmov 0.0   ;;  %v160_v2 = vld [vmem:[#allocation8] sm:$0xff] }
  0x4a   :  { %337 = vmatprep.subr.bf16.mxu1 %v485_v0  ;;  %334 = vmatprep.subr.bf16.mxu0 %v485_v0  ;;  %v161_v3 = vld [vmem:[#allocation8 + $0x8] sm:$0xff]  ;;  %v76_v4 = vld [vmem:[#allocation7] sm:$0xff]  ;;  %v77_v6 = vld [vmem:[#allocation7 + $0x8] sm:$0xff]  ;;  %s488_s20 = smov 64   ;;  %vm85_vm1 = vcmask 130048   ;;  %vm164_vm2 = vcmask 261120  }
  0x4b   :  { %320 = vmatprep.mubr.msk.f32.mxu0 %vm486_vm0, %v487_v1  ;;  %331 = vmatprep.mubr.msk.f32.mxu1 %vm486_vm0, %v487_v1  ;;  %v338_v5 = vpack.c.bf16 %v161_v3, %v160_v2  ;;  %v162_v7 = vld [vmem:[#allocation8 + $0x10] sm:$0xff]  ;;  %v163_v8 = vld [vmem:[#allocation8 + $0x18] sm:$0xff]  ;;  %v335_v9 = vpack.c.bf16 %v77_v6, %v76_v4  ;;  %v306_v10 = vld [vmem:[%s604_s5] ss:$0 sm:$0xff]  ;;  %s490_s22 = smov [#allocation10]  }
  0x4c   :  { %v341_v11 = vpack.c.bf16 %v163_v8, %v162_v7  ;;  %244 = vrot.lane.b32.xlu0 %v306_v10, %s488_s20  ;;  %v75_v12 = vld [vmem:[#allocation2] sm:$0xff]  ;;  %v159_v13 = vld [vmem:[#allocation5] sm:$0xff]  ;;  %s292_s23 = sshll.u32 %s490_s22, 4  ;;  %s293_s23 = int_to_ptr.vmem [resolvable:$true] %s292_s23 }
  0x4d   :  { %339 = vmatpush3.bf16.msra.mxu1 %v338_v5  ;;  %336 = vmatpush3.bf16.msra.mxu0 %v335_v9  ;;  %v303_v20 = vld [vmem:[%s603_s4] ss:$0 sm:$0xff]  ;;  %s489_s4 = smov 32   ;;  %s449_s25 = scalar_lea.vmem %s293_s23, 128 }
  0x4e   :  { %340 = vmatprep.subr.bf16.mxu1 %v485_v0  ;;  %p450_p4 = scmp.ne.s32.totalorder %s293_s23, %s449_s25  ;;  %p454_p5 = scmp.lt.s32.totalorder %s293_s23, %s293_s23 }
  0x4f   :  { %p455_p6 = scmp.lt.s32.totalorder %s449_s25, %s449_s25 }
  0x50   :  { %321 = vmatmul.mubr.msk.f32.vlgmr.msra.gmra.mrb[0].mxu0 %vm85_vm1, %v75_v12 }
  0x51   :  { %342 = vmatpush3.bf16.msra.mxu1 %v341_v11  ;;  %p456_p7 = por %p455_p6, %p454_p5 }
  0x53   :  { %p457_p8 = pnand %p456_p7, %p450_p4 }
  0x54   :  { %332 = vmatmul.mubr.msk.f32.vlgmr.msra.gmra.mrb[0].mxu1 %vm164_vm2, %v159_v13 }
  0xbe   :  { %v245_v15 = vpop.permute.xlu0 %244 }
 0x123   :  { %v155_v14 = vpop.f32.mrb[0].mxu0 }
 0x124   :  { %v322_v16 = vpop.f32.mrb[1].mxu0  ;;  %v156_v21 = vadd.f32 %v303_v20, %v155_v14 }
 0x127   :  { %v234_v17 = vpop.f32.mrb[0].mxu1 }
 0x128   :  { %v247_v18 = vadd.f32 %v245_v15, %v234_v17  ;;  %v333_v19 = vpop.f32.mrb[1].mxu1  ;;  %v248_v22 = vadd.f32 %v234_v17, %v156_v21 }
 0x12a   :  { %256 = vrot.lane.b32.xlu0 %v247_v18, %s488_s20  ;;  %v307_v23 = vmul.f32 -1.442695, %v248_v22 }
 0x12c   :  { %355 = vpow2.f32 %v307_v23 }
 0x136   :  { %v356_v24 = vpop.eup %355 }
 0x137   :  { %v252_v25 = vadd.f32 1.0, %v356_v24 }
 0x139   :  { %357 = vrcp.f32 %v252_v25 }
 0x143   :  { %v358_v26 = vpop.eup %357 }
 0x19c   :  { %v257_v27 = vpop.permute.xlu0 %256 }
 0x19d   :  { %v259_v28 = vmul.f32 %v358_v26, %v257_v27 }
 0x19f   :  { %261 = vrot.lane.b32.xlu1 %v259_v28, %s488_s20 }
 0x211   :  { %v262_v29 = vpop.permute.xlu1 %261 }
 0x212   :  { %v264_v30 = vadd.f32 %v262_v29, %v156_v21 }
 0x214   :  { %359 = vtanh.f32 %v264_v30 }
 0x21e   :  { %v360_v31 = vpop.eup %359 }
 0x21f   :  { %267 = vrot.lane.b32.xlu1 %v360_v31, %s488_s20 }
 0x291   :  { %v268_v32 = vpop.permute.xlu1 %267 }
 0x292   :  { %v270_v33 = vsub.f32 %v159_v13, %v268_v32 }
 0x294   :  { %272 = vrot.lane.b32.xlu0 %v270_v33, %s489_s4 }
 0x306   :  { %v273_v34 = vpop.permute.xlu0 %272 }
 0x307   :  { %v275_v35 = vmul.f32 %v358_v26, %v273_v34 }
 0x309   :  { %277 = vrot.lane.b32.xlu1 %v275_v35, %s489_s4 }
 0x37b   :  { %v278_v36 = vpop.permute.xlu1 %277 }
 0x37c   :  { %v280_v37 = vadd.f32 %v360_v31, %v278_v36 }
 0x37e   :  { %282 = vrot.lane.b32.xlu0 %v280_v37, %s488_s20 }
 0x3f0   :  { %v283_v38 = vpop.permute.xlu0 %282 }
 0x3f1   :  { %285 = vst.msk [vmem:[#allocation10] sm:$0xff] %vm164_vm2, %v283_v38 }
 0x3f2   :  { %460 = shalt.err (!%p457_p8)
}
 0x3f3   :  { %s461_s28 = scalar_lea.hbm %s605_s6, 128 }
 0x3f4   :  { %p462_p9 = scmp.ne.s32.totalorder %s605_s6, %s461_s28  ;;  %p465_p10 = scmp.lt.u32.totalorder %s461_s28, %s605_s6 }
 0x3f6   :  { %p467_p11 = pnand %p465_p10, %p462_p9 }
 0x3f8   :  { %470 = shalt.err (!%p467_p11)
}
 0x3f9   :  { %295 = dma.vmem_to_hbm [thread:$0]  %s293_s23, 128, %s605_s6, [#allocation4]  }
 0x3fa   :  { %477 = dma.done.wait [#allocation4], 128  }
 0x3fb   :  { %478 = vsyncadd [#allocation4], 4294967168 }
 0x3fc   :  { %299 = vsyncpa [#allocation3], 1 }
 0x3fd   :  { %300 = vsyncpa [#allocation6], 1 }
 0x3fe   :  { %301 = vsyncpa [#allocation9], 1 }
 0x3ff   :  { %302 = vsyncpa [#allocation4], 1 }

</bundles_post_ra>
